<compile_context>
chip_gen: v7x
topology: tpu7x:2x2x1
jax: 0.10.0
libtpu: 0.0.40
codegen_flags: <defaults>
</compile_context>

<pallas_src>
import functools
import math

import jax
import jax.numpy as jnp
import numpy as np
from jax.experimental import pallas as pl
from jax.experimental.pallas import tpu as pltpu

LANE = 128      # lane (last-dim) tile
SUBLANE = 16    # bf16 sublane packing (second-to-last dim)
BN_EPS = 1e-5   # torch.nn.BatchNorm1d default


def _ceil_to(x, m):
    return -(-x // m) * m


# ----------------------------------------------------------------------------
# roll-direction guard: we need shifted[:, u] == x[:, u + q] (== jnp.roll(x,-q)).
# A one-time cached probe makes the tap shift robust to the pltpu.roll sign
# convention across JAX versions.
# ----------------------------------------------------------------------------
@functools.lru_cache(maxsize=None)
def _roll_matches_numpy():
    def k(x_ref, o_ref):
        o_ref[...] = pltpu.roll(x_ref[...], shift=1, axis=1)

    x = jnp.arange(8 * 128, dtype=jnp.float32).reshape(8, 128)
    y = pl.pallas_call(k, out_shape=jax.ShapeDtypeStruct((8, 128), jnp.float32))(x)
    return bool(y[0, 1] == x[0, 0])


# ----------------------------------------------------------------------------
# fused encoder kernel (single invocation, everything resident in VMEM)
# ----------------------------------------------------------------------------
def _encoder_kernel(x_ref, w1_ref, b1_ref, w2_ref, b2_ref, o_ref,
                    *, taps, t_pad, t_out, batch, out_channels,
                    roll_like_numpy, eps):
    """x_ref : [Cin_s_pad, B*t_pad]           bf16 (batch folded into lanes)
       w1_ref: [C1_pad,  taps*Cin_s_pad]      bf16 (taps stacked along K)
       b1_ref: [C1_pad, 1]                    f32
       w2_ref: [C2_pad,  C1_pad]              bf16 (1x1 conv)
       b2_ref: [C2_pad, 1]                    f32
       o_ref : [B, out_channels, t_out]       f32 (unpadded final output)
    """
    x = x_ref[...]                                     # bf16, no f32 round-trip
    n = x.shape[-1]                                    # B * t_pad

    # --- strided down-conv: stack the taps along the contraction axis --------
    # Tap q needs shifted[:, u] == x[:, u + q]; the cyclic wrap only lands in
    # padded/invalid lanes (guaranteed by the wrapper's t_out+taps-1 <= t_pad).
    parts = [x]
    for q in range(1, taps):
        shift = (n - q) if roll_like_numpy else q
        parts.append(pltpu.roll(x, shift=shift, axis=1))
    xk = jnp.concatenate(parts, axis=0) if taps > 1 else x   # [taps*Cin, n] bf16

    y1 = jnp.dot(w1_ref[...], xk,
                 preferred_element_type=jnp.float32) + b1_ref[...]   # [C1, n] f32

    # valid-lane mask (local lane < t_out inside each batch segment), built once
    lane = jax.lax.broadcasted_iota(jnp.int32, (1, n), 1)
    mask = (lane % t_pad) < t_out
    count = float(batch * t_out)

    def bn_relu(y):
        # training-mode BatchNorm1d (biased batch var, gamma=1, beta=0) + ReLU,
        # two-pass for numerical stability, all in f32 on the resident tile.
        ym = jnp.where(mask, y, 0.0)
        mean = jnp.sum(ym, axis=1, keepdims=True) / count
        cen = jnp.where(mask, y - mean, 0.0)
        var = jnp.sum(cen * cen, axis=1, keepdims=True) / count
        return jnp.maximum((y - mean) * jax.lax.rsqrt(var + eps), 0.0)

    h1 = bn_relu(y1)                                    # f32 [C1_pad, n]

    # --- ResConBlock placeholder (1x1 conv) + BN/ReLU -------------------------
    y2 = jnp.dot(w2_ref[...], h1.astype(jnp.bfloat16),
                 preferred_element_type=jnp.float32) + b2_ref[...]   # [C2, n] f32
    h2 = bn_relu(y2)

    # TODO(synk): MultiviewAttentionBlock is not defined in the provided
    # reference source; it is treated as identity here.

    # --- write the final result directly in its unpadded shape ---------------
    for b in range(batch):
        o_ref[b] = h2[:out_channels,
                      b * t_pad: b * t_pad + t_out].astype(o_ref.dtype)


# ----------------------------------------------------------------------------
# layout / parameter preparation (done ONCE, not per forward call)
# ----------------------------------------------------------------------------
def space_to_depth(x, stride):
    """[B, C, T] -> [B, C*stride, ceil(T/stride)],
    out[b, c*stride + r, u] = x[b, c, u*stride + r] (stride-phase decomposition)."""
    B, C, T = x.shape
    t_full = _ceil_to(T, stride)
    if t_full != T:
        x = jnp.pad(x, ((0, 0), (0, 0), (0, t_full - T)))
    x = x.reshape(B, C, t_full // stride, stride)
    return x.transpose(0, 1, 3, 2).reshape(B, C * stride, t_full // stride)


def pad_fold_batch(xs, c_pad, t_pad, dtype=jnp.bfloat16):
    """One-time pad + batch->lane fold: [B, C, Ts] -> [c_pad, B*t_pad] bf16,
    batch b occupies lanes [b*t_pad, (b+1)*t_pad)."""
    B, C, Ts = xs.shape
    out = jnp.zeros((B, c_pad, t_pad), dtype)
    out = out.at[:, :C, :Ts].set(xs.astype(dtype))
    return out.transpose(1, 0, 2).reshape(c_pad, B * t_pad)


def prep_down_weight(w, stride, cin_s_pad, cout_pad):
    """PyTorch Conv1d weight [Cout, Cin, K] -> tap-stacked padded bf16
    [cout_pad, taps*cin_s_pad] matching the space-to-depth + lane-shift input."""
    cout, cin, k = w.shape
    q = -(-k // stride)
    w = jnp.pad(w, ((0, 0), (0, 0), (0, q * stride - k)))
    w = w.reshape(cout, cin, q, stride).transpose(0, 2, 1, 3)      # [co, q, ci, r]
    w = w.reshape(cout, q, cin * stride)
    w = jnp.pad(w, ((0, cout_pad - cout), (0, 0), (0, cin_s_pad - cin * stride)))
    return w.reshape(cout_pad, q * cin_s_pad).astype(jnp.bfloat16)


def prep_1x1_weight(w, cin_pad, cout_pad):
    cout, cin, _ = w.shape
    w = jnp.pad(w[:, :, 0], ((0, cout_pad - cout), (0, cin_pad - cin)))
    return w.astype(jnp.bfloat16)


def prep_bias(b, c_pad):
    return jnp.pad(b, (0, c_pad - b.shape[0])).astype(jnp.float32)[:, None]


def init_encoder_params(key, in_channels, out_channels, kernel_size, stride):
    """PyTorch-default-style uniform init.  Weights are padded, tap-stacked and
    cast to bf16 HERE (nothing is reshaped/transposed per forward call)."""
    k1, k2, k3, k4 = jax.random.split(key, 4)

    def uni(k, shape, fan_in):
        bound = 1.0 / math.sqrt(fan_in)
        return jax.random.uniform(k, shape, jnp.float32, -bound, bound)

    cin_s_pad = _ceil_to(in_channels * stride, SUBLANE)
    c_pad = _ceil_to(in_channels, SUBLANE)
    c2_pad = _ceil_to(out_channels, SUBLANE)

    w_down = uni(k1, (in_channels, in_channels, kernel_size), in_channels * kernel_size)
    b_down = uni(k2, (in_channels,), in_channels * kernel_size)
    # TODO(synk): ResConBlock is not defined in the provided reference source;
    # it is approximated by a single 1x1 Conv1d(in_channels -> out_channels)
    # followed by BatchNorm1d + ReLU.
    w_res = uni(k3, (out_channels, in_channels, 1), in_channels)
    b_res = uni(k4, (out_channels,), in_channels)

    params = {
        "w1": prep_down_weight(w_down, stride, cin_s_pad, c_pad),
        "b1": prep_bias(b_down, c_pad),
        "w2": prep_1x1_weight(w_res, c_pad, c2_pad),
        "b2": prep_bias(b_res, c2_pad),
    }
    raw = {"down_w": w_down, "down_b": b_down, "res_w": w_res, "res_b": b_res}
    return params, raw


# ----------------------------------------------------------------------------
# Encoder forward (one fused pallas_call)
# ----------------------------------------------------------------------------
def encoder_forward(params, x, *, kernel_size, stride, out_channels):
    """MANNER Encoder:
         down_conv: Conv1d(C, C, K, stride) -> BatchNorm1d -> ReLU
         ResConBlock placeholder: 1x1 Conv1d(C -> out_channels) -> BN -> ReLU
         MultiviewAttentionBlock placeholder: identity.
    x : [B, in_channels, T] f32 (NCT).  Returns [B, out_channels, T_out] f32.

    BatchNorm uses training-mode batch statistics (fresh gamma=1 / beta=0),
    matching a freshly constructed torch module in train() mode.
    """
    B, C, T = x.shape
    t_out = (T - kernel_size) // stride + 1
    taps = -(-kernel_size // stride)

    c_pad = params["b1"].shape[0]
    c2_pad = params["b2"].shape[0]
    cin_s_pad = params["w1"].shape[1] // taps
    assert params["w2"].shape == (c2_pad, c_pad)

    # One-time layout prep: stride-phase space-to-depth, pad, fold B into lanes.
    xs = space_to_depth(x, stride)                      # [B, C*stride, ceil(T/stride)]
    t_pad = _ceil_to(max(xs.shape[-1], t_out + taps - 1), LANE)
    assert t_out + taps - 1 <= t_pad                    # roll wrap stays in padding
    x0 = pad_fold_batch(xs, cin_s_pad, t_pad)           # bf16 [cin_s_pad, B*t_pad]

    kernel = functools.partial(
        _encoder_kernel, taps=taps, t_pad=t_pad, t_out=t_out, batch=B,
        out_channels=out_channels, roll_like_numpy=_roll_matches_numpy(),
        eps=BN_EPS)

    # Single program; whole arrays resident in VMEM (tens of KB at these shapes).
    # TODO(synk): for long signals add a time-tile grid axis ("parallel" on v7x
    # so both TensorCores are fed) with halo handling for the tapped conv, and
    # size the tile against the v7x 64 MiB VMEM via vmem_limit_bytes.
    return pl.pallas_call(
        kernel,
        out_shape=jax.ShapeDtypeStruct((B, out_channels, t_out), jnp.float32),
    )(x0, params["w1"], params["b1"], params["w2"], params["b2"])


# ----------------------------------------------------------------------------
# pure-JAX f32 reference (same placeholder semantics) for self-checking
# ----------------------------------------------------------------------------
def encoder_reference(raw, x, *, kernel_size, stride, eps=BN_EPS):
    def conv1d(x, w, b, s):
        cout, cin, k = w.shape
        B, _, T = x.shape
        t_out = (T - k) // s + 1
        idx = jnp.arange(t_out)[:, None] * s + jnp.arange(k)[None, :]
        patches = x[:, :, idx]                                  # [B, Cin, Tout, K]
        return jnp.einsum("bitk,oik->bot", patches, w) + b[None, :, None]

    def bn_relu_ref(y):
        mean = y.mean(axis=(0, 2), keepdims=True)
        var = y.var(axis=(0, 2), keepdims=True)
        return jnp.maximum((y - mean) * jax.lax.rsqrt(var + eps), 0.0)

    y = bn_relu_ref(conv1d(x, raw["down_w"], raw["down_b"], stride))
    y = bn_relu_ref(conv1d(y, raw["res_w"], raw["res_b"], 1))
    return y


# ----------------------------------------------------------------------------
if __name__ == "__main__":
    B, C_IN, C_OUT, T = 2, 16, 32, 256
    KSIZE, STRIDE = 4, 2
    SEG_LEN, HEAD = 64, 4   # only used by the (identity) attention placeholder

    key = jax.random.PRNGKey(0)
    kx, kp = jax.random.split(key)
    x = jax.random.normal(kx, (B, C_IN, T), jnp.float32)
    params, raw = init_encoder_params(kp, C_IN, C_OUT, KSIZE, STRIDE)

    _roll_matches_numpy()   # prime the cached roll-direction probe outside jit

    fwd = jax.jit(functools.partial(encoder_forward, kernel_size=KSIZE,
                                    stride=STRIDE, out_channels=C_OUT))
    out = jax.block_until_ready(fwd(params, x))

    t_out = (T - KSIZE) // STRIDE + 1
    assert out.shape == (B, C_OUT, t_out), out.shape
    assert bool(jnp.all(jnp.isfinite(out)))

    ref = encoder_reference(raw, x, kernel_size=KSIZE, stride=STRIDE)
    np.testing.assert_allclose(np.asarray(out), np.asarray(ref),
                               rtol=5e-2, atol=5e-2)

    print("KERNEL_OK")
</pallas_src>

<mosaic_0001>
module attributes {stable_mosaic.version = 11 : i64} {
  func.func @k(%arg0: memref<8x128xf32, #tpu.memory_space<vmem>>, %arg1: memref<8x128xf32, #tpu.memory_space<vmem>>) attributes {dimension_semantics = [], scalar_prefetch = 0 : i64, scratch_operands = 0 : i64, tpu.core_type = #tpu.core_type<tc>} {
    %c0 = arith.constant 0 : index
    %c0_0 = arith.constant 0 : index
    %0 = vector.load %arg0[%c0, %c0_0] : memref<8x128xf32, #tpu.memory_space<vmem>>, vector<8x128xf32>
    %c1_i32 = arith.constant 1 : i32
    %1 = tpu.dynamic_rotate %0 by %c1_i32 dim 1 : vector<8x128xf32>, i32 -> vector<8x128xf32>
    %c0_1 = arith.constant 0 : index
    %c0_2 = arith.constant 0 : index
    %2 = vector.load %arg1[%c0_1, %c0_2] : memref<8x128xf32, #tpu.memory_space<vmem>>, vector<8x128xf32>
    tpu.vector_store %arg1[%c0_1, %c0_2], %1 {strides = array<i32>} : memref<8x128xf32, #tpu.memory_space<vmem>>, vector<8x128xf32>,
    return
  }
}

</mosaic_0001>

<bundles_post_ra>
// kernel: tpu_custom_call.1
= control target key start
LH: loop header
LB: loop body
LE: loop exit
PB: predicated region body
PF: predicated region fallthrough
CT: control target
= control target key end

     0   :  { %6 = vsyncpa [#allocation3], 0  ;;  %s128_s0 = inlined_call_operand.hbm [shape: f32[8,128], index: 0, kind: input, shape index: {}]   ;;  %s129_s1 = inlined_call_operand.hbm [shape: f32[8,128], index: 1, kind: output, shape index: {}]  }
   0x1   :  { %7 = vsyncpa [#allocation4], 0  ;;  %s91_s6 = smov [#allocation2]   ;;  %s43_s10 = scalar_lea.hbm %s128_s0, 128 }
   0x2   :  { %s14_s7 = sshll.u32 %s91_s6, 4  ;;  %p44_p0 = scmp.ne.s32.totalorder %s128_s0, %s43_s10  ;;  %s15_s7 = int_to_ptr.vmem [resolvable:$true] %s14_s7 }
   0x3   :  { %p47_p1 = scmp.lt.u32.totalorder %s43_s10, %s128_s0 }
   0x5   :  { %p49_p2 = pnand %p47_p1, %p44_p0 }
   0x7   :  { %52 = shalt.err (!%p49_p2)
}
   0x8   :  { %s53_s15 = scalar_lea.vmem %s15_s7, 128  ;;  %p58_p4 = scmp.lt.s32.totalorder %s15_s7, %s15_s7 }
   0x9   :  { %p54_p3 = scmp.ne.s32.totalorder %s15_s7, %s53_s15  ;;  %p59_p5 = scmp.lt.s32.totalorder %s53_s15, %s53_s15 }
   0xb   :  { %p60_p6 = por %p59_p5, %p58_p4 }
   0xd   :  { %p61_p7 = pnand %p60_p6, %p54_p3 }
   0xf   :  { %64 = shalt.err (!%p61_p7)
}
  0x10   :  { %17 = dma.hbm_to_vmem [thread:$0]  %s128_s0, 128, %s15_s7, [#allocation3]  }
  0x11   :  { %87 = dma.done.wait [#allocation3], 128  }
  0x12   :  { %88 = vsyncadd [#allocation3], 4294967168  ;;  %v21_v0 = vld [vmem:[#allocation2] sm:$0xff]  ;;  %s92_s18 = smov 1   ;;  %s93_s19 = smov [#allocation5]  }
  0x13   :  { %22 = vrot.lane.b32.xlu0 %v21_v0, %s92_s18  ;;  %s31_s20 = sshll.u32 %s93_s19, 4  ;;  %s32_s20 = int_to_ptr.vmem [resolvable:$true] %s31_s20 }
  0x14   :  { %s65_s21 = scalar_lea.vmem %s32_s20, 128  ;;  %p70_p9 = scmp.lt.s32.totalorder %s32_s20, %s32_s20 }
  0x15   :  { %p66_p8 = scmp.ne.s32.totalorder %s32_s20, %s65_s21  ;;  %p71_p10 = scmp.lt.s32.totalorder %s65_s21, %s65_s21 }
  0x17   :  { %p72_p11 = por %p71_p10, %p70_p9 }
  0x19   :  { %p73_p12 = pnand %p72_p11, %p66_p8 }
  0x85   :  { %v23_v1 = vpop.permute.xlu0 %22 }
  0x86   :  { %24 = vst [vmem:[#allocation5] sm:$0xff] %v23_v1 }
  0x87   :  { %76 = shalt.err (!%p73_p12)
}
  0x88   :  { %s77_s0 = scalar_lea.hbm %s129_s1, 128 }
  0x89   :  { %p78_p13 = scmp.ne.s32.totalorder %s129_s1, %s77_s0  ;;  %p81_p0 = scmp.lt.u32.totalorder %s77_s0, %s129_s1 }
  0x8b   :  { %p83_p1 = pnand %p81_p0, %p78_p13 }
  0x8d   :  { %86 = shalt.err (!%p83_p1)
}
  0x8e   :  { %34 = dma.vmem_to_hbm [thread:$0]  %s32_s20, 128, %s129_s1, [#allocation4]  }
  0x8f   :  { %89 = dma.done.wait [#allocation4], 128  }
  0x90   :  { %90 = vsyncadd [#allocation4], 4294967168 }
  0x91   :  { %38 = vsyncpa [#allocation3], 1 }
  0x92   :  { %39 = vsyncpa [#allocation4], 1 }

</bundles_post_ra>
